<compile_context>
chip_gen: v6e
topology: v6e:2x2x1
jax: 0.10.0
libtpu: 0.0.40
codegen_flags: <defaults>
</compile_context>

<pallas_src>
import jax
import jax.numpy as jnp
import numpy as np
from jax.experimental import pallas as pl
from jax.experimental.pallas import tpu as pltpu

# --- hyperparameters (input_dim - kernel1 - kernel2 == 48, as the classifier needs) ---
INPUT_DIM = 56
CHANNEL1 = 4
KERNEL1 = 5
CHANNEL2 = 8
KERNEL2 = 3
NUM_CLASS = 10
BATCH = 2

L1 = INPUT_DIM - KERNEL1 + 1   # after conv1              = 52
L2 = L1 - 1                    # after maxpool(k=2,s=1)   = 51
L3 = L2 - KERNEL2 + 1          # after conv2              = 49
L4 = L3 - 1                    # after maxpool(k=2,s=1)   = 48
assert L4 == 48, "classifier expects channel2 * 48 features"

W1_COLS = CHANNEL1 * L1        # 208  (conv1 output slab width)
W2_ROWS = W1_COLS - 1          # 207  (pooled conv1 slab width)
W2_COLS = CHANNEL2 * L3        # 392  (conv2 output slab width)
WC_ROWS = W2_COLS - 1          # 391  (pooled conv2 slab width)
NUM_CLASS_PAD = 128            # lane-dense classifier output

MAX_TILE_N = 256               # rows per grid step; fits VMEM on v5e/v6e/v7x


def cnn_kernel(x_ref, wa_t_ref, ba_ref, w1_ref, b1_ref, w2_ref, b2_ref,
               wc_ref, bc_ref, a_ref, xnew_ref, out_ref):
    x = x_ref[...]                                                # (T, D) f32

    # --- atten: a = tanh(x @ Wa^T + ba)        (MXU + EUP) ---
    a = jnp.tanh(jnp.dot(x, wa_t_ref[...],
                         preferred_element_type=jnp.float32) + ba_ref[...])
    a_ref[...] = a

    # --- x_new = x * exp(a)                    (EUP + VPU) ---
    x_new = x * jnp.exp(a)
    xnew_ref[...] = x_new

    # --- conv1 as Toeplitz matmul (MXU) + bias + ReLU on the (T, C1*L1) slab ---
    c1 = jnp.maximum(
        jnp.dot(x_new, w1_ref[...], preferred_element_type=jnp.float32)
        + b1_ref[...], 0.0)

    # MaxPool1d(k=2, s=1): adjacent max on the whole slab. The channel-boundary
    # columns (cross-channel mix) are multiplied by zero rows of W2_toe.
    p1 = jnp.maximum(c1[:, :-1], c1[:, 1:])                       # (T, C1*L1-1)

    # --- conv2 as Toeplitz matmul (MXU) + bias + ReLU ---
    c2 = jnp.maximum(
        jnp.dot(p1, w2_ref[...], preferred_element_type=jnp.float32)
        + b2_ref[...], 0.0)                                       # (T, C2*L3)
    p2 = jnp.maximum(c2[:, :-1], c2[:, 1:])                       # (T, C2*L3-1)

    # --- classifier: one fused matmul, class dim padded to 128 lanes ---
    # TODO(synk): Dropout(p=0.2) is identity here (inference mode); training-mode masking not implemented.
    out_ref[...] = (jnp.dot(p2, wc_ref[...],
                            preferred_element_type=jnp.float32) + bc_ref[...])


def _toeplitz_params(params):
    """Reshape PyTorch-style params into MXU-friendly (banded Toeplitz) slabs."""
    wa, ba, w1, b1, w2, b2, wc, bc = params
    f32 = jnp.float32

    wa_t = wa.T.astype(f32)                                       # (D, D)
    ba2 = ba.reshape(1, INPUT_DIM).astype(f32)

    # conv1 -> (D, C1*L1): W1_toe[t+k, c*L1+t] = w1[c, 0, k]
    c_i, t_i, k_i = np.meshgrid(np.arange(CHANNEL1), np.arange(L1),
                                np.arange(KERNEL1), indexing="ij")
    w1_toe = jnp.zeros((INPUT_DIM, W1_COLS), f32).at[
        (t_i + k_i).ravel(), (c_i * L1 + t_i).ravel()
    ].set(w1[:, 0, :][c_i.ravel(), k_i.ravel()].astype(f32))
    b1_slab = jnp.repeat(b1.astype(f32), L1).reshape(1, W1_COLS)

    # conv2 -> (C1*L1-1, C2*L3): W2_toe[c1*L1+t+k, c2*L3+t] = w2[c2, c1, k]
    # (rows at channel boundaries c1*L1 + L1-1 stay zero -> kill pool garbage)
    c2_i, c1_i, t_i, k_i = np.meshgrid(np.arange(CHANNEL2), np.arange(CHANNEL1),
                                       np.arange(L3), np.arange(KERNEL2),
                                       indexing="ij")
    w2_toe = jnp.zeros((W2_ROWS, W2_COLS), f32).at[
        (c1_i * L1 + t_i + k_i).ravel(), (c2_i * L3 + t_i).ravel()
    ].set(w2[c2_i.ravel(), c1_i.ravel(), k_i.ravel()].astype(f32))
    b2_slab = jnp.repeat(b2.astype(f32), L3).reshape(1, W2_COLS)

    # classifier -> (C2*L3-1, 128): Wc_toe[c2*L3+l, n] = wc[n, c2*L4+l]
    # (zero rows at channel boundaries, zero cols past NUM_CLASS = lane padding)
    n_i, c2_i, l_i = np.meshgrid(np.arange(NUM_CLASS), np.arange(CHANNEL2),
                                 np.arange(L4), indexing="ij")
    wc_toe = jnp.zeros((WC_ROWS, NUM_CLASS_PAD), f32).at[
        (c2_i * L3 + l_i).ravel(), n_i.ravel()
    ].set(wc[n_i.ravel(), (c2_i * L4 + l_i).ravel()].astype(f32))
    bc_pad = jnp.zeros((1, NUM_CLASS_PAD), f32).at[0, :NUM_CLASS].set(
        bc.astype(f32))

    return wa_t, ba2, w1_toe, b1_slab, w2_toe, b2_slab, wc_toe, bc_pad


def _round_up(a, b):
    return (a + b - 1) // b * b


@jax.jit
def cnn_forward(x, params):
    """x: (N, 1, INPUT_DIM) f32. Returns (a, x_new, out) like the PyTorch module."""
    N, _, D = x.shape
    assert D == INPUT_DIM

    tile_n = min(MAX_TILE_N, _round_up(N, 8))     # f32 sublane multiple
    n_pad = _round_up(N, tile_n)

    x2 = x.reshape(N, D).astype(jnp.float32)
    x2 = jnp.pad(x2, ((0, n_pad - N), (0, 0)))

    (wa_t, ba2, w1_toe, b1_slab, w2_toe, b2_slab,
     wc_toe, bc_pad) = _toeplitz_params(params)

    rep = lambda i: (0, 0)        # weights: same (resident) block every step
    row = lambda i: (i, 0)        # activations: tile over the batch axis

    grid_spec = pltpu.PrefetchScalarGridSpec(
        num_scalar_prefetch=0,
        grid=(n_pad // tile_n,),
        in_specs=[
            pl.BlockSpec((tile_n, D), row),                 # x
            pl.BlockSpec((D, D), rep),                      # Wa^T
            pl.BlockSpec((1, D), rep),                      # ba
            pl.BlockSpec((D, W1_COLS), rep),                # conv1 Toeplitz
            pl.BlockSpec((1, W1_COLS), rep),                # b1 slab
            pl.BlockSpec((W2_ROWS, W2_COLS), rep),          # conv2 Toeplitz
            pl.BlockSpec((1, W2_COLS), rep),                # b2 slab
            pl.BlockSpec((WC_ROWS, NUM_CLASS_PAD), rep),    # classifier Toeplitz
            pl.BlockSpec((1, NUM_CLASS_PAD), rep),          # bc (padded)
        ],
        out_specs=(
            pl.BlockSpec((tile_n, D), row),                 # a
            pl.BlockSpec((tile_n, D), row),                 # x_new
            pl.BlockSpec((tile_n, NUM_CLASS_PAD), row),     # logits (padded)
        ),
    )

    a, x_new, out_pad = pl.pallas_call(
        cnn_kernel,
        out_shape=(
            jax.ShapeDtypeStruct((n_pad, D), jnp.float32),
            jax.ShapeDtypeStruct((n_pad, D), jnp.float32),
            jax.ShapeDtypeStruct((n_pad, NUM_CLASS_PAD), jnp.float32),
        ),
        grid_spec=grid_spec,
        compiler_params=pltpu.CompilerParams(
            dimension_semantics=("parallel",)),
    )(x2, wa_t, ba2, w1_toe, b1_slab, w2_toe, b2_slab, wc_toe, bc_pad)

    return (a[:N].reshape(N, 1, D),
            x_new[:N].reshape(N, 1, D),
            out_pad[:N, :NUM_CLASS])


def reference_forward(x, params):
    """Pure-JAX reference reproducing the PyTorch forward (eval mode)."""
    wa, ba, w1, b1, w2, b2, wc, bc = params
    a = jnp.tanh(x @ wa.T + ba)
    x_new = x * jnp.exp(a)
    dn = ('NCH', 'OIH', 'NCH')
    h = jax.lax.conv_general_dilated(x_new, w1, (1,), 'VALID',
                                     dimension_numbers=dn) + b1[None, :, None]
    h = jnp.maximum(h, 0.0)
    h = jnp.maximum(h[:, :, :-1], h[:, :, 1:])        # MaxPool1d(2, stride=1)
    h = jax.lax.conv_general_dilated(h, w2, (1,), 'VALID',
                                     dimension_numbers=dn) + b2[None, :, None]
    h = jnp.maximum(h, 0.0)
    h = jnp.maximum(h[:, :, :-1], h[:, :, 1:])        # MaxPool1d(2, stride=1)
    feat = h.reshape(x.shape[0], -1)
    out = feat @ wc.T + bc
    return a, x_new, out


def init_params(key):
    ks = jax.random.split(key, 8)
    wa = 0.1 * jax.random.normal(ks[0], (INPUT_DIM, INPUT_DIM), jnp.float32)
    ba = 0.1 * jax.random.normal(ks[1], (INPUT_DIM,), jnp.float32)
    w1 = 0.1 * jax.random.normal(ks[2], (CHANNEL1, 1, KERNEL1), jnp.float32)
    b1 = 0.1 * jax.random.normal(ks[3], (CHANNEL1,), jnp.float32)
    w2 = 0.1 * jax.random.normal(ks[4], (CHANNEL2, CHANNEL1, KERNEL2), jnp.float32)
    b2 = 0.1 * jax.random.normal(ks[5], (CHANNEL2,), jnp.float32)
    wc = 0.1 * jax.random.normal(ks[6], (NUM_CLASS, CHANNEL2 * 48), jnp.float32)
    bc = 0.1 * jax.random.normal(ks[7], (NUM_CLASS,), jnp.float32)
    return (wa, ba, w1, b1, w2, b2, wc, bc)


if __name__ == "__main__":
    key = jax.random.PRNGKey(0)
    kx, kp = jax.random.split(key)
    x = jax.random.normal(kx, (BATCH, 1, INPUT_DIM), jnp.float32)
    params = init_params(kp)

    a, x_new, out = cnn_forward(x, params)
    jax.block_until_ready((a, x_new, out))

    # sanity check against a pure-JAX reference (loose tolerance for MXU f32 passes)
    a_r, x_new_r, out_r = reference_forward(x, params)
    assert a.shape == (BATCH, 1, INPUT_DIM)
    assert x_new.shape == (BATCH, 1, INPUT_DIM)
    assert out.shape == (BATCH, NUM_CLASS)
    assert jnp.allclose(a, a_r, atol=1e-2, rtol=1e-2)
    assert jnp.allclose(x_new, x_new_r, atol=1e-2, rtol=1e-2)
    assert jnp.allclose(out, out_r, atol=1e-2, rtol=1e-2)

    print("KERNEL_OK")
</pallas_src>

<mosaic_0001>
module attributes {stable_mosaic.version = 11 : i64} {
  func.func @cnn_kernel(%arg0: i32, %arg1: memref<8x56xf32, #tpu.memory_space<vmem>>, %arg2: memref<56x56xf32, #tpu.memory_space<vmem>>, %arg3: memref<1x56xf32, #tpu.memory_space<vmem>>, %arg4: memref<56x208xf32, #tpu.memory_space<vmem>>, %arg5: memref<1x208xf32, #tpu.memory_space<vmem>>, %arg6: memref<207x392xf32, #tpu.memory_space<vmem>>, %arg7: memref<1x392xf32, #tpu.memory_space<vmem>>, %arg8: memref<391x128xf32, #tpu.memory_space<vmem>>, %arg9: memref<1x128xf32, #tpu.memory_space<vmem>>, %arg10: memref<8x56xf32, #tpu.memory_space<vmem>>, %arg11: memref<8x56xf32, #tpu.memory_space<vmem>>, %arg12: memref<8x128xf32, #tpu.memory_space<vmem>>) attributes {dimension_semantics = [#tpu.dimension_semantics<parallel>], iteration_bounds = array<i64: 1>, scalar_prefetch = 0 : i64, scratch_operands = 0 : i64, tpu.core_type = #tpu.core_type<tc>, window_params = [{transform_indices = @transform_0, window_bounds = array<i64: 8, 56>}, {pipeline_mode = #tpu.pipeline_mode<synchronous>, transform_indices = @transform_1, window_bounds = array<i64: 56, 56>}, {pipeline_mode = #tpu.pipeline_mode<synchronous>, transform_indices = @transform_2, window_bounds = array<i64: 1, 56>}, {pipeline_mode = #tpu.pipeline_mode<synchronous>, transform_indices = @transform_3, window_bounds = array<i64: 56, 208>}, {pipeline_mode = #tpu.pipeline_mode<synchronous>, transform_indices = @transform_4, window_bounds = array<i64: 1, 208>}, {pipeline_mode = #tpu.pipeline_mode<synchronous>, transform_indices = @transform_5, window_bounds = array<i64: 207, 392>}, {pipeline_mode = #tpu.pipeline_mode<synchronous>, transform_indices = @transform_6, window_bounds = array<i64: 1, 392>}, {pipeline_mode = #tpu.pipeline_mode<synchronous>, transform_indices = @transform_7, window_bounds = array<i64: 391, 128>}, {pipeline_mode = #tpu.pipeline_mode<synchronous>, transform_indices = @transform_8, window_bounds = array<i64: 1, 128>}, {transform_indices = @transform_9, window_bounds = array<i64: 8, 56>}, {transform_indices = @transform_10, window_bounds = array<i64: 8, 56>}, {transform_indices = @transform_11, window_bounds = array<i64: 8, 128>}]} {
    %c0 = arith.constant 0 : index
    %c0_0 = arith.constant 0 : index
    %0 = vector.load %arg1[%c0, %c0_0] : memref<8x56xf32, #tpu.memory_space<vmem>>, vector<8x56xf32>
    %c0_1 = arith.constant 0 : index
    %c0_2 = arith.constant 0 : index
    %1 = vector.load %arg2[%c0_1, %c0_2] : memref<56x56xf32, #tpu.memory_space<vmem>>, vector<56x56xf32>
    %cst = arith.constant dense<0.000000e+00> : vector<8x56xf32>
    %2 = tpu.matmul %0, %1, %cst {dimension_numbers = #tpu.dot_dimension_numbers<[1], [0], [0], [1], [0, 0, 1, 1], [], []>} : vector<8x56xf32>, vector<56x56xf32>, vector<8x56xf32> -> vector<8x56xf32>
    %c0_3 = arith.constant 0 : index
    %c0_4 = arith.constant 0 : index
    %3 = vector.load %arg3[%c0_3, %c0_4] : memref<1x56xf32, #tpu.memory_space<vmem>>, vector<1x56xf32>
    %4 = vector.broadcast %3 : vector<1x56xf32> to vector<8x56xf32>
    %5 = arith.addf %2, %4 : vector<8x56xf32>
    %6 = math.tanh %5 : vector<8x56xf32>
    %c0_5 = arith.constant 0 : index
    %c0_6 = arith.constant 0 : index
    %7 = vector.load %arg10[%c0_5, %c0_6] : memref<8x56xf32, #tpu.memory_space<vmem>>, vector<8x56xf32>
    tpu.vector_store %arg10[%c0_5, %c0_6], %6 {strides = array<i32>} : memref<8x56xf32, #tpu.memory_space<vmem>>, vector<8x56xf32>,
    %8 = math.exp %6 : vector<8x56xf32>
    %9 = arith.mulf %0, %8 : vector<8x56xf32>
    %c0_7 = arith.constant 0 : index
    %c0_8 = arith.constant 0 : index
    %10 = vector.load %arg11[%c0_7, %c0_8] : memref<8x56xf32, #tpu.memory_space<vmem>>, vector<8x56xf32>
    tpu.vector_store %arg11[%c0_7, %c0_8], %9 {strides = array<i32>} : memref<8x56xf32, #tpu.memory_space<vmem>>, vector<8x56xf32>,
    %c0_9 = arith.constant 0 : index
    %c0_10 = arith.constant 0 : index
    %11 = vector.load %arg4[%c0_9, %c0_10] : memref<56x208xf32, #tpu.memory_space<vmem>>, vector<56x208xf32>
    %cst_11 = arith.constant dense<0.000000e+00> : vector<8x208xf32>
    %12 = tpu.matmul %9, %11, %cst_11 {dimension_numbers = #tpu.dot_dimension_numbers<[1], [0], [0], [1], [0, 0, 1, 1], [], []>} : vector<8x56xf32>, vector<56x208xf32>, vector<8x208xf32> -> vector<8x208xf32>
    %c0_12 = arith.constant 0 : index
    %c0_13 = arith.constant 0 : index
    %13 = vector.load %arg5[%c0_12, %c0_13] : memref<1x208xf32, #tpu.memory_space<vmem>>, vector<1x208xf32>
    %14 = vector.broadcast %13 : vector<1x208xf32> to vector<8x208xf32>
    %15 = arith.addf %12, %14 : vector<8x208xf32>
    %cst_14 = arith.constant 0.000000e+00 : f32
    %16 = vector.broadcast %cst_14 : f32 to vector<8x208xf32>
    %17 = arith.maximumf %15, %16 : vector<8x208xf32>
    %18 = vector.extract_strided_slice %17 {offsets = [0, 0], sizes = [8, 207], strides = [1, 1]} : vector<8x208xf32> to vector<8x207xf32>
    %19 = vector.extract_strided_slice %17 {offsets = [0, 1], sizes = [8, 207], strides = [1, 1]} : vector<8x208xf32> to vector<8x207xf32>
    %20 = arith.maximumf %18, %19 : vector<8x207xf32>
    %c0_15 = arith.constant 0 : index
    %c0_16 = arith.constant 0 : index
    %21 = vector.load %arg6[%c0_15, %c0_16] : memref<207x392xf32, #tpu.memory_space<vmem>>, vector<207x392xf32>
    %cst_17 = arith.constant dense<0.000000e+00> : vector<8x392xf32>
    %22 = tpu.matmul %20, %21, %cst_17 {dimension_numbers = #tpu.dot_dimension_numbers<[1], [0], [0], [1], [0, 0, 1, 1], [], []>} : vector<8x207xf32>, vector<207x392xf32>, vector<8x392xf32> -> vector<8x392xf32>
    %c0_18 = arith.constant 0 : index
    %c0_19 = arith.constant 0 : index
    %23 = vector.load %arg7[%c0_18, %c0_19] : memref<1x392xf32, #tpu.memory_space<vmem>>, vector<1x392xf32>
    %24 = vector.broadcast %23 : vector<1x392xf32> to vector<8x392xf32>
    %25 = arith.addf %22, %24 : vector<8x392xf32>
    %cst_20 = arith.constant 0.000000e+00 : f32
    %26 = vector.broadcast %cst_20 : f32 to vector<8x392xf32>
    %27 = arith.maximumf %25, %26 : vector<8x392xf32>
    %28 = vector.extract_strided_slice %27 {offsets = [0, 0], sizes = [8, 391], strides = [1, 1]} : vector<8x392xf32> to vector<8x391xf32>
    %29 = vector.extract_strided_slice %27 {offsets = [0, 1], sizes = [8, 391], strides = [1, 1]} : vector<8x392xf32> to vector<8x391xf32>
    %30 = arith.maximumf %28, %29 : vector<8x391xf32>
    %c0_21 = arith.constant 0 : index
    %c0_22 = arith.constant 0 : index
    %31 = vector.load %arg8[%c0_21, %c0_22] : memref<391x128xf32, #tpu.memory_space<vmem>>, vector<391x128xf32>
    %cst_23 = arith.constant dense<0.000000e+00> : vector<8x128xf32>
    %32 = tpu.matmul %30, %31, %cst_23 {dimension_numbers = #tpu.dot_dimension_numbers<[1], [0], [0], [1], [0, 0, 1, 1], [], []>} : vector<8x391xf32>, vector<391x128xf32>, vector<8x128xf32> -> vector<8x128xf32>
    %c0_24 = arith.constant 0 : index
    %c0_25 = arith.constant 0 : index
    %33 = vector.load %arg9[%c0_24, %c0_25] : memref<1x128xf32, #tpu.memory_space<vmem>>, vector<1x128xf32>
    %34 = vector.broadcast %33 : vector<1x128xf32> to vector<8x128xf32>
    %35 = arith.addf %32, %34 : vector<8x128xf32>
    %c0_26 = arith.constant 0 : index
    %c0_27 = arith.constant 0 : index
    %36 = vector.load %arg12[%c0_26, %c0_27] : memref<8x128xf32, #tpu.memory_space<vmem>>, vector<8x128xf32>
    tpu.vector_store %arg12[%c0_26, %c0_27], %35 {strides = array<i32>} : memref<8x128xf32, #tpu.memory_space<vmem>>, vector<8x128xf32>,
    return
  }
  func.func @transform_0(%arg0: i32) -> (i32, i32) {
    %c0_i32 = arith.constant 0 : i32
    %c0_i32_0 = arith.constant 0 : i32
    return %arg0, %c0_i32 : i32, i32
  }
  func.func @transform_1(%arg0: i32) -> (i32, i32) {
    %c0_i32 = arith.constant 0 : i32
    %c0_i32_0 = arith.constant 0 : i32
    %c0_i32_1 = arith.constant 0 : i32
    return %c0_i32, %c0_i32_0 : i32, i32
  }
  func.func @transform_2(%arg0: i32) -> (i32, i32) {
    %c0_i32 = arith.constant 0 : i32
    %c0_i32_0 = arith.constant 0 : i32
    %c0_i32_1 = arith.constant 0 : i32
    return %c0_i32, %c0_i32_0 : i32, i32
  }
  func.func @transform_3(%arg0: i32) -> (i32, i32) {
    %c0_i32 = arith.constant 0 : i32
    %c0_i32_0 = arith.constant 0 : i32
    %c0_i32_1 = arith.constant 0 : i32
    return %c0_i32, %c0_i32_0 : i32, i32
  }
  func.func @transform_4(%arg0: i32) -> (i32, i32) {
    %c0_i32 = arith.constant 0 : i32
    %c0_i32_0 = arith.constant 0 : i32
    %c0_i32_1 = arith.constant 0 : i32
    return %c0_i32, %c0_i32_0 : i32, i32
  }
  func.func @transform_5(%arg0: i32) -> (i32, i32) {
    %c0_i32 = arith.constant 0 : i32
    %c0_i32_0 = arith.constant 0 : i32
    %c0_i32_1 = arith.constant 0 : i32
    return %c0_i32, %c0_i32_0 : i32, i32
  }
  func.func @transform_6(%arg0: i32) -> (i32, i32) {
    %c0_i32 = arith.constant 0 : i32
    %c0_i32_0 = arith.constant 0 : i32
    %c0_i32_1 = arith.constant 0 : i32
    return %c0_i32, %c0_i32_0 : i32, i32
  }
  func.func @transform_7(%arg0: i32) -> (i32, i32) {
    %c0_i32 = arith.constant 0 : i32
    %c0_i32_0 = arith.constant 0 : i32
    %c0_i32_1 = arith.constant 0 : i32
    return %c0_i32, %c0_i32_0 : i32, i32
  }
  func.func @transform_8(%arg0: i32) -> (i32, i32) {
    %c0_i32 = arith.constant 0 : i32
    %c0_i32_0 = arith.constant 0 : i32
    %c0_i32_1 = arith.constant 0 : i32
    return %c0_i32, %c0_i32_0 : i32, i32
  }
  func.func @transform_9(%arg0: i32) -> (i32, i32) {
    %c0_i32 = arith.constant 0 : i32
    %c0_i32_0 = arith.constant 0 : i32
    return %arg0, %c0_i32 : i32, i32
  }
  func.func @transform_10(%arg0: i32) -> (i32, i32) {
    %c0_i32 = arith.constant 0 : i32
    %c0_i32_0 = arith.constant 0 : i32
    return %arg0, %c0_i32 : i32, i32
  }
  func.func @transform_11(%arg0: i32) -> (i32, i32) {
    %c0_i32 = arith.constant 0 : i32
    %c0_i32_0 = arith.constant 0 : i32
    return %arg0, %c0_i32 : i32, i32
  }
}

</mosaic_0001>

<bundles_post_ra>
// kernel: cnn_forward.1
= control target key start
LH: loop header
LB: loop body
LE: loop exit
PB: predicated region body
PF: predicated region fallthrough
CT: control target
= control target key end

     0   :  { %v856_v0 = vmov 0.0   ;;  %vm857_vm0 = vmmov 0   ;;  %vm50_vm1 = vcmask 457728   ;;  %vm374_vm2 = vcmask 1046528   ;;  %s858_s30 = smov 127   ;;  %s1523_s1 = inlined_call_operand.vmem [shape: f32[56,56], index: 1, kind: input, shape index: {}]   ;;  %s1524_s0 = inlined_call_operand.vmem [shape: f32[8,56], index: 0, kind: input, shape index: {}]   ;;  %s1525_s3 = inlined_call_operand.vmem [shape: f32[56,208], index: 3, kind: input, shape index: {}]   ;;  %s1526_s2 = inlined_call_operand.vmem [shape: f32[1,56], index: 2, kind: input, shape index: {}]   ;;  %s1527_s9 = inlined_call_operand.vmem [shape: f32[8,56], index: 9, kind: output, shape index: {0}]   ;;  %s1528_s10 = inlined_call_operand.vmem [shape: f32[8,56], index: 10, kind: output, shape index: {1}]   ;;  %s1529_s5 = inlined_call_operand.vmem [shape: f32[207,392], index: 5, kind: input, shape index: {}]   ;;  %s1530_s4 = inlined_call_operand.vmem [shape: f32[1,208], index: 4, kind: input, shape index: {}]   ;;  %s1531_s7 = inlined_call_operand.vmem [shape: f32[391,128], index: 7, kind: input, shape index: {}]   ;;  %s1532_s6 = inlined_call_operand.vmem [shape: f32[1,392], index: 6, kind: input, shape index: {}]   ;;  %s1533_s8 = inlined_call_operand.vmem [shape: f32[1,128], index: 8, kind: input, shape index: {}]   ;;  %s1534_s11 = inlined_call_operand.vmem [shape: f32[8,128], index: 11, kind: output, shape index: {2}]  }
   0x1   :  { %827 = vmatprep.subr.mxu0 %v856_v0  ;;  %v42_v1 = vld [vmem:[%s1523_s1 + $0x30] sm:$0xff]  ;;  %v41_v2 = vld [vmem:[%s1523_s1 + $0x28] sm:$0xff]  ;;  %841 = vmatprep.mubr.msk.f32.mxu0 %vm857_vm0, %v856_v0  ;;  %v40_v3 = vld [vmem:[%s1523_s1 + $0x20] sm:$0xff]  ;;  %vm238_vm3 = vcmask 1039360   ;;  %vm370_vm4 = vcmask 646144   ;;  %vm612_vm5 = vcmask 56320  }
   0x2   :  { %828 = vmatpush3.msra.mxu0 %v42_v1  ;;  %223 = vmatprep.mubr.f32.mxu1 %v856_v0  ;;  %v39_v4 = vld [vmem:[%s1523_s1 + $0x18] sm:$0xff]  ;;  %v38_v5 = vld [vmem:[%s1523_s1 + $0x10] sm:$0xff]  ;;  %v37_v6 = vld [vmem:[%s1523_s1 + $0x8] sm:$0xff] }
   0x3   :  { %829 = vmatprep.subr.mxu0 %v856_v0  ;;  %v36_v7 = vld [vmem:[%s1523_s1] sm:$0xff]  ;;  %v143_v9 = vld [vmem:[%s1525_s3 + $0x68] sm:$0xff]  ;;  %v141_v11 = vld [vmem:[%s1525_s3 + $0x58] sm:$0xff] }
   0x4   :  { %830 = vmatpush3.msra.mxu0 %v41_v2  ;;  %v35_v8 = vld [vmem:[%s1524_s0] sm:$0xff]  ;;  %177 = vmatprep.subr.mxu1 %v143_v9  ;;  %v140_v12 = vld [vmem:[%s1525_s3 + $0x50] sm:$0xff]  ;;  %v139_v13 = vld [vmem:[%s1525_s3 + $0x48] sm:$0xff] }
   0x5   :  { %831 = vmatprep.subr.mxu0 %v856_v0  ;;  %v142_v10 = vld [vmem:[%s1525_s3 + $0x60] sm:$0xff]  ;;  %v137_v15 = vld [vmem:[%s1525_s3 + $0x38] sm:$0xff]  ;;  %v136_v16 = vld [vmem:[%s1525_s3 + $0x30] sm:$0xff] }
   0x6   :  { %832 = vmatpush3.msra.mxu0 %v40_v3  ;;  %178 = vmatpush1.msra.mxu1 %v142_v10  ;;  %v138_v14 = vld [vmem:[%s1525_s3 + $0x40] sm:$0xff]  ;;  %v135_v17 = vld [vmem:[%s1525_s3 + $0x28] sm:$0xff]  ;;  %v133_v19 = vld [vmem:[%s1525_s3 + $0x18] sm:$0xff] }
   0x7   :  { %833 = vmatprep.subr.mxu0 %v856_v0  ;;  %179 = vmatprep.subr.mxu1 %v141_v11  ;;  %v134_v18 = vld [vmem:[%s1525_s3 + $0x20] sm:$0xff]  ;;  %v132_v20 = vld [vmem:[%s1525_s3 + $0x10] sm:$0xff]  ;;  %v131_v21 = vld [vmem:[%s1525_s3 + $0x8] sm:$0xff] }
   0x8   :  { %834 = vmatpush3.msra.mxu0 %v39_v4  ;;  %180 = vmatpush1.msra.mxu1 %v140_v12  ;;  %v130_v22 = vld [vmem:[%s1525_s3] sm:$0xff]  ;;  %v305_v31 = vld [vmem:[%s1529_s5 + $0x1e8] sm:$0xff]  ;;  %v307_v32 = vld [vmem:[%s1529_s5 + $0x1f8] sm:$0xff] }
   0x9   :  { %835 = vmatprep.subr.mxu0 %v856_v0  ;;  %181 = vmatprep.subr.mxu1 %v139_v13  ;;  %v772_v23 = vld [vmem:[%s1526_s2] ss:$0 sm:$0xff]  ;;  %v306_v34 = vld [vmem:[%s1529_s5 + $0x1f0] sm:$0xff]  ;;  %v301_v35 = vld [vmem:[%s1529_s5 + $0x1c8] sm:$0xff] }
   0xa   :  { %836 = vmatpush3.msra.mxu0 %v38_v5  ;;  %182 = vmatpush1.msra.mxu1 %v138_v14  ;;  %v304_v33 = vld [vmem:[%s1529_s5 + $0x1e0] sm:$0xff]  ;;  %v303_v36 = vld [vmem:[%s1529_s5 + $0x1d8] sm:$0xff]  ;;  %v302_v38 = vld [vmem:[%s1529_s5 + $0x1d0] sm:$0xff] }
   0xb   :  { %837 = vmatprep.subr.mxu0 %v856_v0  ;;  %183 = vmatprep.subr.mxu1 %v137_v15  ;;  %v300_v37 = vld [vmem:[%s1529_s5 + $0x1c0] sm:$0xff]  ;;  %v297_v39 = vld [vmem:[%s1529_s5 + $0x1a8] sm:$0xff]  ;;  %v299_v40 = vld [vmem:[%s1529_s5 + $0x1b8] sm:$0xff] }
   0xc   :  { %838 = vmatpush3.msra.mxu0 %v37_v6  ;;  %184 = vmatpush1.msra.mxu1 %v136_v16  ;;  %v296_v41 = vld [vmem:[%s1529_s5 + $0x1a0] sm:$0xff]  ;;  %v298_v42 = vld [vmem:[%s1529_s5 + $0x1b0] sm:$0xff]  ;;  %v293_v43 = vld [vmem:[%s1529_s5 + $0x188] sm:$0xff] }
   0xd   :  { %839 = vmatprep.subr.mxu0 %v856_v0  ;;  %185 = vmatprep.subr.mxu1 %v135_v17  ;;  %v295_v44 = vld [vmem:[%s1529_s5 + $0x198] sm:$0xff]  ;;  %v292_v45 = vld [vmem:[%s1529_s5 + $0x180] sm:$0xff]  ;;  %v294_v46 = vld [vmem:[%s1529_s5 + $0x190] sm:$0xff] }
   0xe   :  { %840 = vmatpush3.msra.mxu0 %v36_v7  ;;  %186 = vmatpush1.msra.mxu1 %v134_v18  ;;  %v289_v47 = vld [vmem:[%s1529_s5 + $0x168] sm:$0xff]  ;;  %v291_v48 = vld [vmem:[%s1529_s5 + $0x178] sm:$0xff]  ;;  %v288_v49 = vld [vmem:[%s1529_s5 + $0x160] sm:$0xff] }
   0xf   :  { %842 = vmatmul.mubr.msk.f32.vlgmr.msra.gmra.mxu0 %vm50_vm1, %v35_v8  ;;  %187 = vmatprep.subr.mxu1 %v133_v19  ;;  %v290_v50 = vld [vmem:[%s1529_s5 + $0x170] sm:$0xff]  ;;  %v285_v51 = vld [vmem:[%s1529_s5 + $0x148] sm:$0xff]  ;;  %v287_v52 = vld [vmem:[%s1529_s5 + $0x158] sm:$0xff] }
  0x10   :  { %188 = vmatpush1.msra.mxu1 %v132_v20  ;;  %387 = vmatprep.subr.mxu0 %v305_v31  ;;  %v284_v53 = vld [vmem:[%s1529_s5 + $0x140] sm:$0xff]  ;;  %v286_v54 = vld [vmem:[%s1529_s5 + $0x150] sm:$0xff]  ;;  %v281_v55 = vld [vmem:[%s1529_s5 + $0x128] sm:$0xff] }
  0x11   :  { %189 = vmatprep.subr.mxu1 %v131_v21  ;;  %388 = vmatpush1.msra.mxu0 %v304_v33  ;;  %v283_v56 = vld [vmem:[%s1529_s5 + $0x138] sm:$0xff]  ;;  %v280_v57 = vld [vmem:[%s1529_s5 + $0x120] sm:$0xff]  ;;  %v282_v58 = vld [vmem:[%s1529_s5 + $0x130] sm:$0xff] }
  0x12   :  { %190 = vmatpush1.msra.mxu1 %v130_v22  ;;  %389 = vmatprep.subr.mxu0 %v301_v35  ;;  %v277_v59 = vld [vmem:[%s1529_s5 + $0x108] sm:$0xff]  ;;  %v279_v60 = vld [vmem:[%s1529_s5 + $0x118] sm:$0xff]  ;;  %v276_v61 = vld [vmem:[%s1529_s5 + $0x100] sm:$0xff] }
  0x13   :  { %458 = vmatprep.subr.mxu1 %v307_v32  ;;  %390 = vmatpush1.msra.mxu0 %v300_v37  ;;  %v278_v62 = vld [vmem:[%s1529_s5 + $0x110] sm:$0xff]  ;;  %v273_v63 = vld [vmem:[%s1529_s5 + $0xe8] sm:$0xff]  ;;  %v275_v1 = vld [vmem:[%s1529_s5 + $0xf8] sm:$0xff] }
  0x14   :  { %391 = vmatprep.subr.mxu0 %v297_v39  ;;  %v272_v2 = vld [vmem:[%s1529_s5 + $0xe0] sm:$0xff]  ;;  %v274_v3 = vld [vmem:[%s1529_s5 + $0xf0] sm:$0xff]  ;;  %v269_v4 = vld [vmem:[%s1529_s5 + $0xc8] sm:$0xff] }
  0x15   :  { %392 = vmatpush1.msra.mxu0 %v296_v41  ;;  %v271_v5 = vld [vmem:[%s1529_s5 + $0xd8] sm:$0xff]  ;;  %v268_v6 = vld [vmem:[%s1529_s5 + $0xc0] sm:$0xff]  ;;  %v270_v7 = vld [vmem:[%s1529_s5 + $0xd0] sm:$0xff] }
  0x16   :  { %393 = vmatprep.subr.mxu0 %v293_v43  ;;  %v267_v9 = vld [vmem:[%s1529_s5 + $0xb8] sm:$0xff]  ;;  %v264_v10 = vld [vmem:[%s1529_s5 + $0xa0] sm:$0xff]  ;;  %v266_v11 = vld [vmem:[%s1529_s5 + $0xb0] sm:$0xff] }
  0x17   :  { %394 = vmatpush1.msra.mxu0 %v292_v45  ;;  %v261_v12 = vld [vmem:[%s1529_s5 + $0x88] sm:$0xff]  ;;  %v263_v13 = vld [vmem:[%s1529_s5 + $0x98] sm:$0xff]  ;;  %v260_v14 = vld [vmem:[%s1529_s5 + $0x80] sm:$0xff] }
  0x18   :  { %395 = vmatprep.subr.mxu0 %v289_v47  ;;  %v262_v15 = vld [vmem:[%s1529_s5 + $0x90] sm:$0xff]  ;;  %v257_v16 = vld [vmem:[%s1529_s5 + $0x68] sm:$0xff]  ;;  %v259_v17 = vld [vmem:[%s1529_s5 + $0x78] sm:$0xff] }
  0x19   :  { %396 = vmatpush1.msra.mxu0 %v288_v49  ;;  %v256_v18 = vld [vmem:[%s1529_s5 + $0x60] sm:$0xff]  ;;  %v258_v19 = vld [vmem:[%s1529_s5 + $0x70] sm:$0xff]  ;;  %v253_v20 = vld [vmem:[%s1529_s5 + $0x48] sm:$0xff] }
  0x1a   :  { %397 = vmatprep.subr.mxu0 %v285_v51  ;;  %v255_v21 = vld [vmem:[%s1529_s5 + $0x58] sm:$0xff]  ;;  %v252_v22 = vld [vmem:[%s1529_s5 + $0x40] sm:$0xff]  ;;  %v246_v31 = vld [vmem:[%s1529_s5 + $0x10] sm:$0xff] }
  0x1b   :  { %398 = vmatpush1.msra.mxu0 %v284_v53  ;;  %v345_v32 = vld [vmem:[%s1529_s5 + $0x328] sm:$0x7f]  ;;  %v347_v33 = vld [vmem:[%s1529_s5 + $0x338] sm:$0x7f]  ;;  %v346_v35 = vld [vmem:[%s1529_s5 + $0x330] sm:$0x7f] }
  0x1c   :  { %399 = vmatprep.subr.mxu0 %v281_v55  ;;  %v343_v37 = vld [vmem:[%s1529_s5 + $0x318] sm:$0xff]  ;;  %v342_v39 = vld [vmem:[%s1529_s5 + $0x310] sm:$0xff] }
  0x1d   :  { %400 = vmatpush1.msra.mxu0 %v280_v57  ;;  %v339_v41 = vld [vmem:[%s1529_s5 + $0x2f8] sm:$0xff]  ;;  %v338_v43 = vld [vmem:[%s1529_s5 + $0x2f0] sm:$0xff] }
  0x1e   :  { %401 = vmatprep.subr.mxu0 %v277_v59  ;;  %v335_v45 = vld [vmem:[%s1529_s5 + $0x2d8] sm:$0xff]  ;;  %v334_v47 = vld [vmem:[%s1529_s5 + $0x2d0] sm:$0xff] }
  0x1f   :  { %402 = vmatpush1.msra.mxu0 %v276_v61  ;;  %v331_v49 = vld [vmem:[%s1529_s5 + $0x2b8] sm:$0xff]  ;;  %v330_v51 = vld [vmem:[%s1529_s5 + $0x2b0] sm:$0xff] }
  0x20   :  { %403 = vmatprep.subr.mxu0 %v273_v63  ;;  %v327_v53 = vld [vmem:[%s1529_s5 + $0x298] sm:$0xff]  ;;  %v326_v55 = vld [vmem:[%s1529_s5 + $0x290] sm:$0xff] }
  0x21   :  { %404 = vmatpush1.msra.mxu0 %v272_v2  ;;  %v323_v57 = vld [vmem:[%s1529_s5 + $0x278] sm:$0xff]  ;;  %v322_v61 = vld [vmem:[%s1529_s5 + $0x270] sm:$0xff] }
  0x22   :  { %405 = vmatprep.subr.mxu0 %v269_v4  ;;  %v319_v63 = vld [vmem:[%s1529_s5 + $0x258] sm:$0xff]  ;;  %v318_v2 = vld [vmem:[%s1529_s5 + $0x250] sm:$0xff]  ;;  %v313_v4 = vld [vmem:[%s1529_s5 + $0x228] sm:$0xff] }
  0x23   :  { %406 = vmatpush1.msra.mxu0 %v268_v6  ;;  %v144_v6 = vld [vmem:[%s1530_s4] sm:$0x3] }
  0xcf   :  { %v120_v24 = vpop.f32.mrf.mxu0 }
  0xd0   :  { %v121_v25 = vadd.f32 %v772_v23, %v120_v24  ;;  %v254_v23 = vld [vmem:[%s1529_s5 + $0x50] sm:$0xff]  ;;  %v249_v24 = vld [vmem:[%s1529_s5 + $0x28] sm:$0xff] }
  0xd1   :  { %v843_v26 = vpop.f32.mrf.mxu0 }
  0xd2   :  { %852 = vtanh.f32 %v121_v25  ;;  %v251_v25 = vld [vmem:[%s1529_s5 + $0x38] sm:$0xff]  ;;  %v248_v26 = vld [vmem:[%s1529_s5 + $0x20] sm:$0xff] }
  0xdf   :  { %v853_v27 = vpop.eup %852 }
  0xe0   :  { %125 = vst.msk [vmem:[%s1527_s9] sm:$0xff] %vm50_vm1, %v853_v27  ;;  %v126_v28 = vmul.f32 1.442695, %v853_v27  ;;  %v250_v27 = vld [vmem:[%s1529_s5 + $0x30] sm:$0xff] }
  0xe2   :  { %854 = vpow2.f32 %v126_v28  ;;  %v245_v28 = vld [vmem:[%s1529_s5 + $0x8] sm:$0xff] }
  0xef   :  { %v855_v29 = vpop.eup %854 }
  0xf0   :  { %v128_v30 = vmul.f32 %v855_v29, %v35_v8  ;;  %v265_v8 = vld [vmem:[%s1529_s5 + $0xa8] sm:$0xff]  ;;  %v247_v29 = vld [vmem:[%s1529_s5 + $0x18] sm:$0xff] }
  0xf1   :  { %407 = vmatprep.subr.mxu0 %v265_v8  ;;  %v312_v8 = vld [vmem:[%s1529_s5 + $0x220] sm:$0xff] }
  0xf2   :  { %129 = vst.msk [vmem:[%s1528_s10] sm:$0xff] %vm50_vm1, %v128_v30  ;;  %774 = vmatmul.mubr.msk.f32.vlgmr.msra.gmra.mxu1 %vm50_vm1, %v128_v30  ;;  %408 = vmatpush1.msra.mxu0 %v264_v10  ;;  %v244_v30 = vld [vmem:[%s1529_s5] sm:$0xff]  ;;  %v309_v10 = vld [vmem:[%s1529_s5 + $0x208] sm:$0xff] }
  0xf3   :  { %459 = vmatpush1.msra.mxu1 %v306_v34  ;;  %409 = vmatprep.subr.mxu0 %v261_v12  ;;  %v344_v34 = vld [vmem:[%s1529_s5 + $0x320] sm:$0x7f] }
  0xf4   :  { %460 = vmatprep.subr.mxu1 %v303_v36  ;;  %410 = vmatpush1.msra.mxu0 %v260_v14  ;;  %v341_v36 = vld [vmem:[%s1529_s5 + $0x308] sm:$0xff]  ;;  %v310_v14 = vld [vmem:[%s1529_s5 + $0x210] sm:$0xff] }
  0xf5   :  { %461 = vmatpush1.msra.mxu1 %v302_v38  ;;  %411 = vmatprep.subr.mxu0 %v257_v16  ;;  %v340_v38 = vld [vmem:[%s1529_s5 + $0x300] sm:$0xff] }
  0xf6   :  { %462 = vmatprep.subr.mxu1 %v299_v40  ;;  %412 = vmatpush1.msra.mxu0 %v256_v18  ;;  %v337_v40 = vld [vmem:[%s1529_s5 + $0x2e8] sm:$0xff] }
  0xf7   :  { %463 = vmatpush1.msra.mxu1 %v298_v42  ;;  %413 = vmatprep.subr.mxu0 %v253_v20  ;;  %v336_v42 = vld [vmem:[%s1529_s5 + $0x2e0] sm:$0xff] }
  0xf8   :  { %464 = vmatprep.subr.mxu1 %v295_v44  ;;  %414 = vmatpush1.msra.mxu0 %v252_v22  ;;  %v333_v44 = vld [vmem:[%s1529_s5 + $0x2c8] sm:$0xff] }
  0xf9   :  { %465 = vmatpush1.msra.mxu1 %v294_v46  ;;  %415 = vmatprep.subr.mxu0 %v249_v24  ;;  %v332_v46 = vld [vmem:[%s1529_s5 + $0x2c0] sm:$0xff] }
  0xfa   :  { %466 = vmatprep.subr.mxu1 %v291_v48  ;;  %416 = vmatpush1.msra.mxu0 %v248_v26  ;;  %v329_v48 = vld [vmem:[%s1529_s5 + $0x2a8] sm:$0xff] }
  0xfb   :  { %467 = vmatpush1.msra.mxu1 %v290_v50  ;;  %417 = vmatprep.subr.mxu0 %v245_v28  ;;  %v328_v50 = vld [vmem:[%s1529_s5 + $0x2a0] sm:$0xff]  ;;  %v602_v28 = vld [vmem:[%s1531_s7 + $0x170] sm:$0xff] }
  0xfc   :  { %468 = vmatprep.subr.mxu1 %v287_v52  ;;  %418 = vmatpush1.msra.mxu0 %v244_v30  ;;  %v325_v52 = vld [vmem:[%s1529_s5 + $0x288] sm:$0xff]  ;;  %v571_v30 = vld [vmem:[%s1531_s7 + $0x78] sm:$0xff] }
  0xfd   :  { %469 = vmatpush1.msra.mxu1 %v286_v54  ;;  %775 = vmatprep.subr.msk.mxu0 %vm374_vm2, %v345_v32  ;;  %v324_v54 = vld [vmem:[%s1529_s5 + $0x280] sm:$0xff]  ;;  %v601_v32 = vld [vmem:[%s1531_s7 + $0x168] sm:$0xff] }
  0xfe   :  { %470 = vmatprep.subr.mxu1 %v283_v56  ;;  %776 = vmatpush2.msk.msra.mxu0 %vm374_vm2, %v344_v34  ;;  %v321_v56 = vld [vmem:[%s1529_s5 + $0x268] sm:$0xff] }
  0xff   :  { %471 = vmatpush1.msra.mxu1 %v282_v58  ;;  %433 = vmatprep.subr.mxu0 %v341_v36  ;;  %v146_v58 = vlaneseq  ;;  %v585_v34 = vld [vmem:[%s1531_s7 + $0xe8] sm:$0xff]  ;;  %v600_v36 = vld [vmem:[%s1531_s7 + $0x160] sm:$0xff] }
 0x100   :  { %472 = vmatprep.subr.mxu1 %v279_v60  ;;  %434 = vmatpush2.msra.mxu0 %v340_v38  ;;  %v320_v60 = vld [vmem:[%s1529_s5 + $0x260] sm:$0xff] }
 0x101   :  { %473 = vmatpush1.msra.mxu1 %v278_v62  ;;  %435 = vmatprep.subr.mxu0 %v337_v40  ;;  %v1281_v59 = vshrl.u32 %v146_v58, 7  ;;  %v317_v62 = vld [vmem:[%s1529_s5 + $0x248] sm:$0xff]  ;;  %v568_v38 = vld [vmem:[%s1531_s7 + $0x60] sm:$0xff]  ;;  %v583_v40 = vld [vmem:[%s1531_s7 + $0xd8] sm:$0xff] }
 0x102   :  { %474 = vmatprep.subr.mxu1 %v275_v1  ;;  %436 = vmatpush2.msra.mxu0 %v336_v42  ;;  %v316_v1 = vld [vmem:[%s1529_s5 + $0x240] sm:$0xff]  ;;  %v598_v42 = vld [vmem:[%s1531_s7 + $0x150] sm:$0xff]  ;;  %v577_v58 = vld [vmem:[%s1531_s7 + $0xa8] sm:$0xff] }
 0x103   :  { %475 = vmatpush1.msra.mxu1 %v274_v3  ;;  %437 = vmatprep.subr.mxu0 %v333_v44  ;;  %v148_v3 = vsub.s32 0, %v1281_v59  ;;  %v566_v44 = vld [vmem:[%s1531_s7 + $0x50] sm:$0xff] }
 0x104   :  { %476 = vmatprep.subr.mxu1 %v271_v5  ;;  %438 = vmatpush2.msra.mxu0 %v332_v46  ;;  %v315_v5 = vld [vmem:[%s1529_s5 + $0x238] sm:$0xff]  ;;  %v581_v46 = vld [vmem:[%s1531_s7 + $0xc8] sm:$0xff] }
 0x105   :  { %477 = vmatpush1.msra.mxu1 %v270_v7  ;;  %439 = vmatprep.subr.mxu0 %v329_v48  ;;  %v152_v7 = vsub.s32 1, %v1281_v59  ;;  %v149_v12 = vrot.slane %v144_v6, %v148_v3  ;;  %v596_v48 = vld [vmem:[%s1531_s7 + $0x140] sm:$0xff] }
 0x106   :  { %478 = vmatprep.subr.mxu1 %v267_v9  ;;  %440 = vmatpush2.msra.mxu0 %v328_v50  ;;  %v314_v9 = vld [vmem:[%s1529_s5 + $0x230] sm:$0xff]  ;;  %v564_v50 = vld [vmem:[%s1531_s7 + $0x40] sm:$0xff] }
 0x107   :  { %479 = vmatpush1.msra.mxu1 %v266_v11  ;;  %441 = vmatprep.subr.mxu0 %v325_v52  ;;  %v311_v11 = vld [vmem:[%s1529_s5 + $0x218] sm:$0xff] }
 0x108   :  { %480 = vmatprep.subr.mxu1 %v263_v13  ;;  %442 = vmatpush2.msra.mxu0 %v324_v54  ;;  %v308_v13 = vld [vmem:[%s1529_s5 + $0x200] sm:$0xff]  ;;  %v579_v52 = vld [vmem:[%s1531_s7 + $0xb8] sm:$0xff]  ;;  %v594_v54 = vld [vmem:[%s1531_s7 + $0x130] sm:$0xff] }
 0x109   :  { %481 = vmatpush1.msra.mxu1 %v262_v15  ;;  %443 = vmatprep.subr.mxu0 %v321_v56  ;;  %v153_v15 = vrot.slane %v144_v6, %v152_v7  ;;  %v562_v56 = vld [vmem:[%s1531_s7 + $0x30] sm:$0xff]  ;;  %v575_v6 = vld [vmem:[%s1531_s7 + $0x98] sm:$0xff] }
 0x10a   :  { %482 = vmatprep.subr.mxu1 %v259_v17  ;;  %444 = vmatpush2.msra.mxu0 %v320_v60  ;;  %v561_v60 = vld [vmem:[%s1531_s7 + $0x28] sm:$0xff] }
 0x10b   :  { %483 = vmatpush1.msra.mxu1 %v258_v19  ;;  %445 = vmatprep.subr.mxu0 %v317_v62  ;;  %v591_v62 = vld [vmem:[%s1531_s7 + $0x118] sm:$0xff] }
 0x10c   :  { %484 = vmatprep.subr.mxu1 %v255_v21  ;;  %446 = vmatpush2.msra.mxu0 %v316_v1  ;;  %v360_v1 = vsub.s32 2, %v1281_v59 }
 0x10d   :  { %485 = vmatpush1.msra.mxu1 %v254_v23  ;;  %447 = vmatprep.subr.mxu0 %v313_v4  ;;  %v590_v4 = vld [vmem:[%s1531_s7 + $0x110] sm:$0xff] }
 0x10e   :  { %486 = vmatprep.subr.mxu1 %v251_v25  ;;  %448 = vmatpush2.msra.mxu0 %v312_v8  ;;  %v364_v8 = vsub.s32 3, %v1281_v59 }
 0x10f   :  { %487 = vmatpush1.msra.mxu1 %v250_v27  ;;  %449 = vmatprep.subr.mxu0 %v309_v10  ;;  %v603_v27 = vld [vmem:[%s1531_s7 + $0x178] sm:$0xff]  ;;  %v589_v10 = vld [vmem:[%s1531_s7 + $0x108] sm:$0xff] }
 0x110   :  { %488 = vmatprep.subr.mxu1 %v247_v29  ;;  %450 = vmatpush2.msra.mxu0 %v308_v13  ;;  %v587_v29 = vld [vmem:[%s1531_s7 + $0xf8] sm:$0xff]  ;;  %v558_v13 = vld [vmem:[%s1531_s7 + $0x10] sm:$0xff] }
 0x111   :  { %489 = vmatpush1.msra.mxu1 %v246_v31  ;;  %792 = vmatprep.subr.mxu0 %v587_v29  ;;  %v586_v31 = vld [vmem:[%s1531_s7 + $0xf0] sm:$0xff] }
 0x112   :  { %778 = vmatprep.subr.msk.mxu1 %vm374_vm2, %v347_v33  ;;  %v570_v33 = vld [vmem:[%s1531_s7 + $0x70] sm:$0xff] }
 0x113   :  { %779 = vmatpush2.msk.msra.mxu1 %vm374_vm2, %v346_v35  ;;  %v569_v35 = vld [vmem:[%s1531_s7 + $0x68] sm:$0xff] }
 0x114   :  { %504 = vmatprep.subr.mxu1 %v343_v37  ;;  %v584_v37 = vld [vmem:[%s1531_s7 + $0xe0] sm:$0xff] }
 0x115   :  { %505 = vmatpush2.msra.mxu1 %v342_v39  ;;  %v599_v39 = vld [vmem:[%s1531_s7 + $0x158] sm:$0xff] }
 0x116   :  { %506 = vmatprep.subr.mxu1 %v339_v41  ;;  %v567_v41 = vld [vmem:[%s1531_s7 + $0x58] sm:$0xff] }
 0x117   :  { %507 = vmatpush2.msra.mxu1 %v338_v43  ;;  %v582_v43 = vld [vmem:[%s1531_s7 + $0xd0] sm:$0xff] }
 0x118   :  { %508 = vmatprep.subr.mxu1 %v335_v45  ;;  %v597_v45 = vld [vmem:[%s1531_s7 + $0x148] sm:$0xff] }
 0x119   :  { %509 = vmatpush2.msra.mxu1 %v334_v47  ;;  %v565_v47 = vld [vmem:[%s1531_s7 + $0x48] sm:$0xff] }
 0x11a   :  { %510 = vmatprep.subr.mxu1 %v331_v49  ;;  %v580_v49 = vld [vmem:[%s1531_s7 + $0xc0] sm:$0xff] }
 0x11b   :  { %511 = vmatpush2.msra.mxu1 %v330_v51  ;;  %v595_v51 = vld [vmem:[%s1531_s7 + $0x138] sm:$0xff] }
 0x11c   :  { %512 = vmatprep.subr.mxu1 %v327_v53  ;;  %v563_v53 = vld [vmem:[%s1531_s7 + $0x38] sm:$0xff] }
 0x11d   :  { %513 = vmatpush2.msra.mxu1 %v326_v55  ;;  %v578_v55 = vld [vmem:[%s1531_s7 + $0xb0] sm:$0xff] }
 0x11e   :  { %514 = vmatprep.subr.mxu1 %v323_v57  ;;  %v593_v57 = vld [vmem:[%s1531_s7 + $0x128] sm:$0xff] }
 0x11f   :  { %515 = vmatpush2.msra.mxu1 %v322_v61  ;;  %v592_v61 = vld [vmem:[%s1531_s7 + $0x120] sm:$0xff] }
 0x120   :  { %516 = vmatprep.subr.mxu1 %v319_v63  ;;  %v576_v63 = vld [vmem:[%s1531_s7 + $0xa0] sm:$0xff] }
 0x121   :  { %517 = vmatpush2.msra.mxu1 %v318_v2  ;;  %v560_v2 = vld [vmem:[%s1531_s7 + $0x20] sm:$0xff] }
 0x122   :  { %518 = vmatprep.subr.mxu1 %v315_v5  ;;  %v348_v5 = vld [vmem:[%s1532_s6] sm:$0xf] }
 0x123   :  { %519 = vmatpush2.msra.mxu1 %v314_v9  ;;  %v559_v9 = vld [vmem:[%s1531_s7 + $0x18] sm:$0xff] }
 0x124   :  { %520 = vmatprep.subr.mxu1 %v311_v11  ;;  %v574_v11 = vld [vmem:[%s1531_s7 + $0x90] sm:$0xff] }
 0x125   :  { %521 = vmatpush2.msra.mxu1 %v310_v14  ;;  %v588_v14 = vld [vmem:[%s1531_s7 + $0x100] sm:$0xff] }
 0x126   :  { %689 = vmatprep.subr.mxu1 %v856_v0 }
 0x1b2   :  { %v225_v16 = vpop.f32.mrf.mxu1 }
 0x1b3   :  { %v226_v17 = vadd.f32 %v225_v16, %v149_v12  ;;  %v361_v12 = vrot.slane %v348_v5, %v360_v1  ;;  %v357_v16 = vrot.slane %v348_v5, %v152_v7  ;;  %v572_v7 = vld [vmem:[%s1531_s7 + $0x80] sm:$0xff] }
 0x1b4   :  { %v227_v18 = vpop.f32.mrf.mxu1 }
 0x1b5   :  { %v230_v19 = vmax.f32 %v226_v17, 0.0  ;;  %v228_v20 = vadd.f32 %v227_v18, %v153_v15  ;;  %v573_v15 = vld [vmem:[%s1531_s7 + $0x88] sm:$0xff]  ;;  %v365_v17 = vrot.slane %v348_v5, %v364_v8 }
 0x1b6   :  { %v557_v18 = vld [vmem:[%s1531_s7 + $0x8] sm:$0xff] }
 0x1b7   :  { %234 = vrot.lane.b32.xlu0 %v230_v19, %s858_s30  ;;  %v231_v21 = vmax.f32 %v228_v20, 0.0 }
 0x1bb   :  { %236 = vrot.lane.b32.xlu0 %v231_v21, %s858_s30 }
 0x229   :  { %v235_v22 = vpop.permute.xlu0 %234 }
 0x22d   :  { %v237_v23 = vpop.permute.xlu0 %236 }
 0x22e   :  { %v239_v24 = vsel %vm238_vm3, %v235_v22, %v237_v23  ;;  %v243_v25 = vmax.f32 %v231_v21, %v237_v23 }
 0x22f   :  { %v242_v26 = vmax.f32 %v230_v19, %v239_v24  ;;  %v604_v19 = vld [vmem:[%s1531_s7 + $0x180] sm:$0x7f] }
 0x230   :  { %777 = vmatprep.mubr.msk.f32.mxu0 %vm370_vm4, %v243_v25  ;;  %780 = vmatprep.mubr.msk.f32.mxu1 %vm370_vm4, %v243_v25  ;;  %v353_v25 = vrot.slane %v348_v5, %v148_v3 }
 0x231   :  { %452 = vmatmul.mubr.f32.vlgmr.msra.gmra.mxu0 %v242_v26  ;;  %523 = vmatmul.mubr.f32.vlgmr.msra.gmra.mxu1 %v242_v26 }
 0x232   :  { %690 = vmatpush1.msra.mxu1 %v603_v27  ;;  %793 = vmatpush3.msra.mxu0 %v571_v30 }
 0x233   :  { %691 = vmatprep.subr.mxu1 %v856_v0  ;;  %794 = vmatprep.subr.mxu0 %v586_v31 }
 0x234   :  { %692 = vmatpush1.msra.mxu1 %v602_v28  ;;  %795 = vmatpush3.msra.mxu0 %v570_v33 }
 0x235   :  { %693 = vmatprep.subr.mxu1 %v856_v0  ;;  %796 = vmatprep.subr.mxu0 %v585_v34 }
 0x236   :  { %694 = vmatpush1.msra.mxu1 %v601_v32  ;;  %797 = vmatpush3.msra.mxu0 %v569_v35 }
 0x237   :  { %695 = vmatprep.subr.mxu1 %v856_v0  ;;  %798 = vmatprep.subr.mxu0 %v584_v37 }
 0x238   :  { %696 = vmatpush1.msra.mxu1 %v600_v36  ;;  %799 = vmatpush3.msra.mxu0 %v568_v38 }
 0x239   :  { %697 = vmatprep.subr.mxu1 %v856_v0  ;;  %800 = vmatprep.subr.mxu0 %v583_v40 }
 0x23a   :  { %698 = vmatpush1.msra.mxu1 %v599_v39  ;;  %801 = vmatpush3.msra.mxu0 %v567_v41 }
 0x23b   :  { %699 = vmatprep.subr.mxu1 %v856_v0  ;;  %802 = vmatprep.subr.mxu0 %v582_v43 }
 0x23c   :  { %700 = vmatpush1.msra.mxu1 %v598_v42  ;;  %803 = vmatpush3.msra.mxu0 %v566_v44 }
 0x23d   :  { %701 = vmatprep.subr.mxu1 %v856_v0  ;;  %804 = vmatprep.subr.mxu0 %v581_v46 }
 0x23e   :  { %702 = vmatpush1.msra.mxu1 %v597_v45  ;;  %805 = vmatpush3.msra.mxu0 %v565_v47  ;;  %v781_v47 = vld [vmem:[%s1533_s8] ss:$0 sm:$0xff] }
 0x23f   :  { %703 = vmatprep.subr.mxu1 %v856_v0  ;;  %806 = vmatprep.subr.mxu0 %v580_v49 }
 0x240   :  { %704 = vmatpush1.msra.mxu1 %v596_v48  ;;  %807 = vmatpush3.msra.mxu0 %v564_v50 }
 0x241   :  { %705 = vmatprep.subr.mxu1 %v856_v0  ;;  %808 = vmatprep.subr.mxu0 %v579_v52 }
 0x242   :  { %706 = vmatpush1.msra.mxu1 %v595_v51  ;;  %809 = vmatpush3.msra.mxu0 %v563_v53 }
 0x243   :  { %707 = vmatprep.subr.mxu1 %v856_v0  ;;  %810 = vmatprep.subr.mxu0 %v578_v55 }
 0x244   :  { %708 = vmatpush1.msra.mxu1 %v594_v54  ;;  %811 = vmatpush3.msra.mxu0 %v562_v56 }
 0x245   :  { %709 = vmatprep.subr.mxu1 %v856_v0  ;;  %812 = vmatprep.subr.mxu0 %v577_v58 }
 0x246   :  { %710 = vmatpush1.msra.mxu1 %v593_v57  ;;  %813 = vmatpush3.msra.mxu0 %v561_v60 }
 0x247   :  { %711 = vmatprep.subr.mxu1 %v856_v0  ;;  %814 = vmatprep.subr.mxu0 %v576_v63 }
 0x248   :  { %712 = vmatpush1.msra.mxu1 %v592_v61  ;;  %815 = vmatpush3.msra.mxu0 %v560_v2 }
 0x249   :  { %713 = vmatprep.subr.mxu1 %v856_v0  ;;  %816 = vmatprep.subr.mxu0 %v575_v6 }
 0x24a   :  { %714 = vmatpush1.msra.mxu1 %v591_v62  ;;  %817 = vmatpush3.msra.mxu0 %v559_v9 }
 0x24b   :  { %715 = vmatprep.subr.mxu1 %v856_v0  ;;  %818 = vmatprep.subr.mxu0 %v574_v11 }
 0x24c   :  { %716 = vmatpush1.msra.mxu1 %v590_v4  ;;  %819 = vmatpush3.msra.mxu0 %v558_v13 }
 0x24d   :  { %717 = vmatprep.subr.mxu1 %v856_v0  ;;  %820 = vmatprep.subr.mxu0 %v573_v15 }
 0x24e   :  { %718 = vmatpush1.msra.mxu1 %v589_v10  ;;  %821 = vmatpush3.msra.mxu0 %v557_v18 }
 0x24f   :  { %719 = vmatprep.subr.mxu1 %v856_v0  ;;  %822 = vmatprep.subr.mxu0 %v572_v7 }
 0x250   :  { %720 = vmatpush1.msra.mxu1 %v588_v14 }
 0x251   :  { %751 = vmatprep.subr.mxu1 %v856_v0  ;;  %v556_v0 = vld [vmem:[%s1531_s7] sm:$0xff] }
 0x252   :  { %782 = vmatpush2.msk.msra.mxu1 %vm374_vm2, %v604_v19  ;;  %823 = vmatpush3.msra.mxu0 %v556_v0 }
 0x2f1   :  { %v453_v20 = vpop.f32.mrf.mxu0  ;;  %v524_v21 = vpop.f32.mrf.mxu1 }
 0x2f2   :  { %v525_v22 = vadd.f32 %v524_v21, %v361_v12  ;;  %v454_v31 = vadd.f32 %v453_v20, %v353_v25 }
 0x2f3   :  { %v455_v23 = vpop.f32.mrf.mxu0  ;;  %v526_v24 = vpop.f32.mrf.mxu1 }
 0x2f4   :  { %v456_v26 = vadd.f32 %v455_v23, %v357_v16  ;;  %v527_v27 = vadd.f32 %v526_v24, %v365_v17  ;;  %v531_v28 = vmax.f32 %v525_v22, 0.0  ;;  %v529_v33 = vmax.f32 %v454_v31, 0.0 }
 0x2f6   :  { %v530_v29 = vmax.f32 %v456_v26, 0.0  ;;  %v532_v30 = vmax.f32 %v527_v27, 0.0 }
 0x2f8   :  { %543 = vrot.lane.b32.xlu0 %v532_v30, %s858_s30  ;;  %v847_v32 = vpack.i.bf16 %v531_v28, %v530_v29 }
 0x2fa   :  { %848 = vrot.lane.b32.xlu1 %v847_v32, %s858_s30 }
 0x2fe   :  { %537 = vrot.lane.b32.xlu1 %v529_v33, %s858_s30 }
 0x36a   :  { %v544_v34 = vpop.permute.xlu0 %543 }
 0x36b   :  { %v555_v35 = vmax.f32 %v532_v30, %v544_v34 }
 0x36c   :  { %v849_v36 = vpop.permute.xlu1 %848 }
 0x36d   :  { %v851_v59 = vunpack.i.h.bf16 %v849_v36  ;;  %v850_v3 = vunpack.i.l.bf16 %v849_v36  ;;  %783 = vmatprep.mubr.msk.f32.mxu1 %vm612_vm5, %v555_v35 }
 0x36f   :  { %v547_v37 = vsel %vm238_vm3, %v851_v59, %v544_v34  ;;  %v546_v38 = vsel %vm238_vm3, %v850_v3, %v851_v59 }
 0x370   :  { %v554_v39 = vmax.f32 %v531_v28, %v547_v37  ;;  %v538_v40 = vpop.permute.xlu1 %537  ;;  %v553_v41 = vmax.f32 %v530_v29, %v546_v38 }
 0x371   :  { %v545_v42 = vsel %vm238_vm3, %v538_v40, %v850_v3 }
 0x372   :  { %v552_v43 = vmax.f32 %v529_v33, %v545_v42  ;;  %683 = vmatprep.mubr.f32.mxu0 %v553_v41  ;;  %754 = vmatmul.mubr.f32.vlgmr.msra.gmra.mxu1 %v554_v39 }
 0x374   :  { %684 = vmatmul.mubr.f32.vlgmr.msra.gmra.mxu0 %v552_v43 }
 0x432   :  { %v755_v44 = vpop.f32.mrf.mxu1 }
 0x434   :  { %v824_v45 = vpop.f32.mrf.mxu0  ;;  %v757_v46 = vpop.f32.mrf.mxu1 }
 0x436   :  { %v825_v48 = vpop.f32.mrf.mxu0 }
 0x437   :  { %v826_v49 = vadd.f32 %v825_v48, %v824_v45 }
 0x439   :  { %v686_v50 = vadd.f32 %v826_v49, %v781_v47 }
 0x43b   :  { %v756_v51 = vadd.f32 %v755_v44, %v686_v50 }
 0x43d   :  { %759 = vst [vmem:[%s1534_s11] sm:$0xff] %v756_v51 }

</bundles_post_ra>
